<compile_context>
chip_gen: v6e
topology: v6e:2x2x1
jax: 0.10.0
libtpu: 0.0.40
codegen_flags: <defaults>
</compile_context>

<pallas_src>
import functools

import numpy as np
import jax
import jax.numpy as jnp
from jax.experimental import pallas as pl
from jax.experimental.pallas import tpu as pltpu


# ----------------------------------------------------------------------------- kernel
def _generator_output_kernel(h_ref, n_ref, w1h_ref, w1n_ref, b1_ref,
                             w2_ref, b2_ref, o_ref):
    """Fused  cat -> Linear -> ReLU -> Linear -> Sigmoid  on one row-tile.

    h_ref : (TM, Hs)  bf16/f32    n_ref : (TM, Ns)  bf16/f32
    w1h   : (Hs, Hid) f32         w1n   : (Ns, Hid) f32     b1 : (1, Hid) f32
    w2    : (Hid, Ys) f32         b2    : (1, Ys)   f32
    o_ref : (TM, Ys)  f32
    """
    # Upcast the (possibly bf16) activations; all math is done in f32.
    hf = h_ref[...].astype(jnp.float32)
    nf = n_ref[...].astype(jnp.float32)

    # Layer 1: concat expressed as split-weight matmuls (no copy of cat(h, n)).
    z = jnp.dot(hf, w1h_ref[...], preferred_element_type=jnp.float32)
    z = z + jnp.dot(nf, w1n_ref[...], preferred_element_type=jnp.float32)
    z = jnp.maximum(z + b1_ref[...], 0.0)                       # bias + ReLU

    # Layer 2 + sigmoid epilogue (exp goes to the EUP slot).
    y = jnp.dot(z, w2_ref[...], preferred_element_type=jnp.float32) + b2_ref[...]
    o_ref[...] = 1.0 / (1.0 + jnp.exp(-y))


# ----------------------------------------------------------------------------- helpers
def _round_up(x, m):
    return (x + m - 1) // m * m


def _choose_row_tile(M, cap=4096):
    """Row tile (multiple of 8).  Guarantees >=2 grid steps whenever M > 64 so
    v7x's two TensorCores both get work; otherwise one full-problem block."""
    if M <= 64:
        return _round_up(M, 8)
    return min(cap, _round_up(pl.cdiv(M, 2), 64))


# ----------------------------------------------------------------------------- one-time param prep
def prepare_generator_params(params, h_size):
    """Hoist weight transpose/split + bias reshapes out of the per-call forward."""
    w1, b1, w2, b2 = params["w1"], params["b1"], params["w2"], params["b2"]
    hid = w1.shape[0]
    ys = w2.shape[0]
    w1t = jnp.asarray(w1, jnp.float32).T          # (Hs+Ns, Hid)
    return {
        "w1h": w1t[:h_size, :],                   # (Hs, Hid)
        "w1n": w1t[h_size:, :],                   # (Ns, Hid)
        "b1": jnp.asarray(b1, jnp.float32).reshape(1, hid),
        "w2t": jnp.asarray(w2, jnp.float32).T,    # (Hid, Ys)
        "b2": jnp.asarray(b2, jnp.float32).reshape(1, ys),
    }


# ----------------------------------------------------------------------------- wrapper
def generator_output_forward(prepped, h, n, temperature=1.0, *,
                             cast_inputs_to_bf16=True, row_tile_cap=4096):
    """h: (B, S, h_size), n: (B, S, n_size)  ->  (B, S, y_size) in f32."""
    del temperature  # unused in the PyTorch forward as well
    B, S, Hs = h.shape
    _, _, Ns = n.shape
    w1h, w1n, b1, w2t, b2 = (prepped[k] for k in ("w1h", "w1n", "b1", "w2t", "b2"))
    Hid = w1h.shape[1]
    Ys = w2t.shape[1]

    # Flatten (B, S) -> rows; rows map to sublanes, features stay on lanes.
    M = B * S
    h2 = h.reshape(M, Hs)
    n2 = n.reshape(M, Ns)
    if cast_inputs_to_bf16:
        # Halves input HBM traffic at the pallas_call boundary; matmul
        # accumulation stays f32 inside the kernel.
        h2 = h2.astype(jnp.bfloat16)
        n2 = n2.astype(jnp.bfloat16)
    in_bytes = 2 if cast_inputs_to_bf16 else 4

    TM = _choose_row_tile(M, row_tile_cap)
    grid = pl.cdiv(M, TM)   # no wrapper-side padding; Pallas masks the last block

    cost = pl.CostEstimate(
        flops=2 * M * (Hs + Ns) * Hid + 2 * M * Hid * Ys,
        transcendentals=M * Ys,
        bytes_accessed=(M * (Hs + Ns) * in_bytes            # activations in
                        + M * Ys * 4                        # output
                        + ((Hs + Ns) * Hid + Hid + Hid * Ys + Ys) * 4),  # params
    )

    def wspec(shape):
        return pl.BlockSpec(shape, lambda i: (0, 0))

    # TODO(synk): a lane-dense (TM//8, 8*Ys) output slab would make the Ys=16
    # stores unmasked, but needs an in-kernel cross-tile relayout whose Mosaic
    # lowering support is not guaranteed; kept the plain (TM, Ys) store.
    out = pl.pallas_call(
        _generator_output_kernel,
        out_shape=jax.ShapeDtypeStruct((M, Ys), jnp.float32),
        grid_spec=pltpu.PrefetchScalarGridSpec(
            num_scalar_prefetch=0,
            grid=(grid,),
            in_specs=[
                pl.BlockSpec((TM, Hs), lambda i: (i, 0)),   # h rows
                pl.BlockSpec((TM, Ns), lambda i: (i, 0)),   # n rows
                wspec((Hs, Hid)),                           # W1 (h part)
                wspec((Ns, Hid)),                           # W1 (n part)
                wspec((1, Hid)),                            # b1
                wspec((Hid, Ys)),                           # W2
                wspec((1, Ys)),                             # b2
            ],
            out_specs=pl.BlockSpec((TM, Ys), lambda i: (i, 0)),
        ),
        compiler_params=pltpu.CompilerParams(
            dimension_semantics=("parallel",),
            vmem_limit_bytes=32 * 1024 * 1024,   # headroom for big tiles on v5e
        ),
        cost_estimate=cost,
    )(h2, n2, w1h, w1n, b1, w2t, b2)

    return out.reshape(B, S, Ys)


# ----------------------------------------------------------------------------- params
def init_params(key, h_size, n_size, y_size, hidden=64):
    """Default PyTorch nn.Linear init: U(-1/sqrt(fan_in), 1/sqrt(fan_in))."""
    k1, k2, k3, k4 = jax.random.split(key, 4)
    fin1 = h_size + n_size
    a1 = 1.0 / np.sqrt(fin1)
    a2 = 1.0 / np.sqrt(hidden)
    return {
        "w1": jax.random.uniform(k1, (hidden, fin1), jnp.float32, -a1, a1),
        "b1": jax.random.uniform(k2, (hidden,), jnp.float32, -a1, a1),
        "w2": jax.random.uniform(k3, (y_size, hidden), jnp.float32, -a2, a2),
        "b2": jax.random.uniform(k4, (y_size,), jnp.float32, -a2, a2),
    }


# ----------------------------------------------------------------------------- pure-JAX reference
def reference_forward(params, h, n, temperature=1.0):
    y_cat = jnp.concatenate([h, n], axis=2)
    z = jnp.maximum(jnp.einsum("bsf,of->bso", y_cat, params["w1"]) + params["b1"], 0.0)
    y = jnp.einsum("bsf,of->bso", z, params["w2"]) + params["b2"]
    return 1.0 / (1.0 + jnp.exp(-y))


# ----------------------------------------------------------------------------- main
if __name__ == "__main__":
    h_size, n_size, y_size = 32, 16, 16
    B, S = 2, 8

    key = jax.random.PRNGKey(0)
    kp, kh, kn = jax.random.split(key, 3)
    params = init_params(kp, h_size, n_size, y_size)
    h = jax.random.normal(kh, (B, S, h_size), jnp.float32)
    n = jax.random.normal(kn, (B, S, n_size), jnp.float32)
    temperature = 1.0  # accepted but unused, same as the PyTorch module

    prepped = prepare_generator_params(params, h_size)
    fwd = jax.jit(functools.partial(generator_output_forward, prepped))
    out = fwd(h, n, temperature)
    out = jax.block_until_ready(out)
    assert out.shape == (B, S, y_size), out.shape

    # Tight check: reference fed the same bf16-quantized activations the kernel sees.
    h_q = h.astype(jnp.bfloat16).astype(jnp.float32)
    n_q = n.astype(jnp.bfloat16).astype(jnp.float32)
    ref_q = reference_forward(params, h_q, n_q, temperature)
    assert bool(jnp.allclose(out, ref_q, atol=1e-5, rtol=1e-5)), "mismatch vs bf16-input reference"

    # Loose sanity check against the pure-f32 reference (bf16 input quantization only).
    ref = reference_forward(params, h, n, temperature)
    assert bool(jnp.allclose(out, ref, atol=2e-2, rtol=2e-2)), "mismatch vs f32 reference"

    print("KERNEL_OK")
</pallas_src>

<mosaic_0001>
module attributes {stable_mosaic.version = 11 : i64} {
  func.func @_generator_output_kernel(%arg0: i32, %arg1: memref<16x32xbf16, #tpu.memory_space<vmem>>, %arg2: memref<16x16xbf16, #tpu.memory_space<vmem>>, %arg3: memref<32x64xf32, #tpu.memory_space<vmem>>, %arg4: memref<16x64xf32, #tpu.memory_space<vmem>>, %arg5: memref<1x64xf32, #tpu.memory_space<vmem>>, %arg6: memref<64x16xf32, #tpu.memory_space<vmem>>, %arg7: memref<1x16xf32, #tpu.memory_space<vmem>>, %arg8: memref<16x16xf32, #tpu.memory_space<vmem>>) attributes {dimension_semantics = [#tpu.dimension_semantics<parallel>], iteration_bounds = array<i64: 1>, scalar_prefetch = 0 : i64, scratch_operands = 0 : i64, tpu.core_type = #tpu.core_type<tc>, window_params = [{transform_indices = @transform_0, window_bounds = array<i64: 16, 32>}, {transform_indices = @transform_1, window_bounds = array<i64: 16, 16>}, {pipeline_mode = #tpu.pipeline_mode<synchronous>, transform_indices = @transform_2, window_bounds = array<i64: 32, 64>}, {pipeline_mode = #tpu.pipeline_mode<synchronous>, transform_indices = @transform_3, window_bounds = array<i64: 16, 64>}, {pipeline_mode = #tpu.pipeline_mode<synchronous>, transform_indices = @transform_4, window_bounds = array<i64: 1, 64>}, {pipeline_mode = #tpu.pipeline_mode<synchronous>, transform_indices = @transform_5, window_bounds = array<i64: 64, 16>}, {pipeline_mode = #tpu.pipeline_mode<synchronous>, transform_indices = @transform_6, window_bounds = array<i64: 1, 16>}, {transform_indices = @transform_7, window_bounds = array<i64: 16, 16>}]} {
    %c0 = arith.constant 0 : index
    %c0_0 = arith.constant 0 : index
    %0 = vector.load %arg1[%c0, %c0_0] : memref<16x32xbf16, #tpu.memory_space<vmem>>, vector<16x32xbf16>
    %1 = arith.extf %0 : vector<16x32xbf16> to vector<16x32xf32>
    %c0_1 = arith.constant 0 : index
    %c0_2 = arith.constant 0 : index
    %2 = vector.load %arg2[%c0_1, %c0_2] : memref<16x16xbf16, #tpu.memory_space<vmem>>, vector<16x16xbf16>
    %3 = arith.extf %2 : vector<16x16xbf16> to vector<16x16xf32>
    %c0_3 = arith.constant 0 : index
    %c0_4 = arith.constant 0 : index
    %4 = vector.load %arg3[%c0_3, %c0_4] : memref<32x64xf32, #tpu.memory_space<vmem>>, vector<32x64xf32>
    %cst = arith.constant dense<0.000000e+00> : vector<16x64xf32>
    %5 = tpu.matmul %1, %4, %cst {dimension_numbers = #tpu.dot_dimension_numbers<[1], [0], [0], [1], [0, 0, 1, 1], [], []>} : vector<16x32xf32>, vector<32x64xf32>, vector<16x64xf32> -> vector<16x64xf32>
    %c0_5 = arith.constant 0 : index
    %c0_6 = arith.constant 0 : index
    %6 = vector.load %arg4[%c0_5, %c0_6] : memref<16x64xf32, #tpu.memory_space<vmem>>, vector<16x64xf32>
    %cst_7 = arith.constant dense<0.000000e+00> : vector<16x64xf32>
    %7 = tpu.matmul %3, %6, %cst_7 {dimension_numbers = #tpu.dot_dimension_numbers<[1], [0], [0], [1], [0, 0, 1, 1], [], []>} : vector<16x16xf32>, vector<16x64xf32>, vector<16x64xf32> -> vector<16x64xf32>
    %8 = arith.addf %5, %7 : vector<16x64xf32>
    %c0_8 = arith.constant 0 : index
    %c0_9 = arith.constant 0 : index
    %9 = vector.load %arg5[%c0_8, %c0_9] : memref<1x64xf32, #tpu.memory_space<vmem>>, vector<1x64xf32>
    %10 = vector.broadcast %9 : vector<1x64xf32> to vector<16x64xf32>
    %11 = arith.addf %8, %10 : vector<16x64xf32>
    %cst_10 = arith.constant 0.000000e+00 : f32
    %12 = vector.broadcast %cst_10 : f32 to vector<16x64xf32>
    %13 = arith.maximumf %11, %12 : vector<16x64xf32>
    %c0_11 = arith.constant 0 : index
    %c0_12 = arith.constant 0 : index
    %14 = vector.load %arg6[%c0_11, %c0_12] : memref<64x16xf32, #tpu.memory_space<vmem>>, vector<64x16xf32>
    %cst_13 = arith.constant dense<0.000000e+00> : vector<16x16xf32>
    %15 = tpu.matmul %13, %14, %cst_13 {dimension_numbers = #tpu.dot_dimension_numbers<[1], [0], [0], [1], [0, 0, 1, 1], [], []>} : vector<16x64xf32>, vector<64x16xf32>, vector<16x16xf32> -> vector<16x16xf32>
    %c0_14 = arith.constant 0 : index
    %c0_15 = arith.constant 0 : index
    %16 = vector.load %arg7[%c0_14, %c0_15] : memref<1x16xf32, #tpu.memory_space<vmem>>, vector<1x16xf32>
    %17 = vector.broadcast %16 : vector<1x16xf32> to vector<16x16xf32>
    %18 = arith.addf %15, %17 : vector<16x16xf32>
    %cst_16 = arith.constant 0.000000e+00 : f32
    %19 = vector.broadcast %cst_16 : f32 to vector<16x16xf32>
    %20 = arith.subf %19, %18 : vector<16x16xf32>
    %21 = math.exp %20 : vector<16x16xf32>
    %cst_17 = arith.constant 1.000000e+00 : f32
    %22 = vector.broadcast %cst_17 : f32 to vector<16x16xf32>
    %23 = arith.addf %22, %21 : vector<16x16xf32>
    %cst_18 = arith.constant 1.000000e+00 : f32
    %24 = vector.broadcast %cst_18 : f32 to vector<16x16xf32>
    %25 = arith.divf %24, %23 : vector<16x16xf32>
    %c0_19 = arith.constant 0 : index
    %c0_20 = arith.constant 0 : index
    %26 = vector.load %arg8[%c0_19, %c0_20] : memref<16x16xf32, #tpu.memory_space<vmem>>, vector<16x16xf32>
    tpu.vector_store %arg8[%c0_19, %c0_20], %25 {strides = array<i32>} : memref<16x16xf32, #tpu.memory_space<vmem>>, vector<16x16xf32>,
    return
  }
  func.func @transform_0(%arg0: i32) -> (i32, i32) {
    %c0_i32 = arith.constant 0 : i32
    %c0_i32_0 = arith.constant 0 : i32
    return %arg0, %c0_i32 : i32, i32
  }
  func.func @transform_1(%arg0: i32) -> (i32, i32) {
    %c0_i32 = arith.constant 0 : i32
    %c0_i32_0 = arith.constant 0 : i32
    return %arg0, %c0_i32 : i32, i32
  }
  func.func @transform_2(%arg0: i32) -> (i32, i32) {
    %c0_i32 = arith.constant 0 : i32
    %c0_i32_0 = arith.constant 0 : i32
    %c0_i32_1 = arith.constant 0 : i32
    return %c0_i32, %c0_i32_0 : i32, i32
  }
  func.func @transform_3(%arg0: i32) -> (i32, i32) {
    %c0_i32 = arith.constant 0 : i32
    %c0_i32_0 = arith.constant 0 : i32
    %c0_i32_1 = arith.constant 0 : i32
    return %c0_i32, %c0_i32_0 : i32, i32
  }
  func.func @transform_4(%arg0: i32) -> (i32, i32) {
    %c0_i32 = arith.constant 0 : i32
    %c0_i32_0 = arith.constant 0 : i32
    %c0_i32_1 = arith.constant 0 : i32
    return %c0_i32, %c0_i32_0 : i32, i32
  }
  func.func @transform_5(%arg0: i32) -> (i32, i32) {
    %c0_i32 = arith.constant 0 : i32
    %c0_i32_0 = arith.constant 0 : i32
    %c0_i32_1 = arith.constant 0 : i32
    return %c0_i32, %c0_i32_0 : i32, i32
  }
  func.func @transform_6(%arg0: i32) -> (i32, i32) {
    %c0_i32 = arith.constant 0 : i32
    %c0_i32_0 = arith.constant 0 : i32
    %c0_i32_1 = arith.constant 0 : i32
    return %c0_i32, %c0_i32_0 : i32, i32
  }
  func.func @transform_7(%arg0: i32) -> (i32, i32) {
    %c0_i32 = arith.constant 0 : i32
    %c0_i32_0 = arith.constant 0 : i32
    return %arg0, %c0_i32 : i32, i32
  }
}

</mosaic_0001>

<bundles_post_ra>
// kernel: generator_output_forward.1
= control target key start
LH: loop header
LB: loop body
LE: loop exit
PB: predicated region body
PF: predicated region fallthrough
CT: control target
= control target key end

     0   :  { %12 = vsyncpa [#allocation3], 0  ;;  %s579_s0 = inlined_call_operand.vmem [shape: bf16[16,32], index: 0, kind: input, shape index: {}]   ;;  %s580_s1 = inlined_call_operand.vmem [shape: bf16[16,16], index: 1, kind: input, shape index: {}]   ;;  %s581_s2 = inlined_call_operand.vmem [shape: f32[32,64], index: 2, kind: input, shape index: {}]   ;;  %s582_s3 = inlined_call_operand.vmem [shape: f32[16,64], index: 3, kind: input, shape index: {}]   ;;  %s583_s4 = inlined_call_operand.vmem [shape: f32[1,64], index: 4, kind: input, shape index: {}]   ;;  %s584_s5 = inlined_call_operand.hbm [shape: f32[64,16], index: 5, kind: input, shape index: {}]   ;;  %s585_s6 = inlined_call_operand.vmem [shape: f32[1,16], index: 6, kind: input, shape index: {}]   ;;  %s586_s7 = inlined_call_operand.hbm [shape: f32[16,16], index: 7, kind: output, shape index: {}]  }
   0x1   :  { %13 = vsyncpa [#allocation4], 0  ;;  %s487_s24 = smov [#allocation2]  }
   0x2   :  { %s29_s25 = sshll.u32 %s487_s24, 4  ;;  %s30_s25 = int_to_ptr.vmem [resolvable:$true] %s29_s25 }
   0x3   :  { %s451_s26 = scalar_lea.vmem %s30_s25, 1024  ;;  %p456_p1 = scmp.lt.s32.totalorder %s30_s25, %s30_s25 }
   0x4   :  { %p452_p0 = scmp.ne.s32.totalorder %s30_s25, %s451_s26  ;;  %p457_p2 = scmp.lt.s32.totalorder %s451_s26, %s451_s26 }
   0x6   :  { %p458_p3 = por %p457_p2, %p456_p1 }
   0x8   :  { %p459_p4 = pnand %p458_p3, %p452_p0 }
   0xa   :  { %462 = shalt.err (!%p459_p4)
}
   0xb   :  { %s488_s27 = smov 128   ;;  %s489_s28 = smov 8  }
   0xc   :  { %35 = dma.hbm_to_vmem [thread:$0]  %s584_s5, 1024, %s30_s25, [#allocation3], %s488_s27, %s488_s27, %s489_s28  }
   0xd   :  { %483 = dma.done.wait [#allocation3], 1024  }
   0xe   :  { %484 = vsyncadd [#allocation3], 4294966272  ;;  %v54_v0 = vld [vmem:[%s582_s3 + $0x8] sm:$0xff]  ;;  %v53_v1 = vld [vmem:[%s582_s3] sm:$0xff]  ;;  %vm55_vm0 = vcmask 130048   ;;  %vm137_vm1 = vcmask 261120  }
   0xf   :  { %v371_v2 = vld [vmem:[%s580_s1] sm:$0xff]   ;;  %394 = vmatprep.subr.mxu1 %v54_v0  ;;  %v52_v5 = vld [vmem:[%s581_s2 + $0x18] sm:$0xff]  ;;  %v51_v8 = vld [vmem:[%s581_s2 + $0x10] sm:$0xff]  ;;  %vm245_vm2 = vcmask 523264  }
  0x10   :  { %v372_v3 = vunpack.c.l.bf16 %v371_v2  ;;  %v373_v4 = vunpack.c.h.bf16 %v371_v2  ;;  %395 = vmatpush3.msra.mxu1 %v54_v0  ;;  %v367_v6 = vld [vmem:[%s579_s0] sm:$0xff]   ;;  %v50_v9 = vld [vmem:[%s581_s2 + $0x8] sm:$0xff]  ;;  %v237_v12 = vld [vmem:[#allocation2 + $0x38] sm:$0xff] }
  0x11   :  { %396 = vmatprep.subr.mxu1 %v53_v1  ;;  %v368_v7 = vunpack.c.l.bf16 %v367_v6  ;;  %v49_v10 = vld [vmem:[%s581_s2] sm:$0xff]  ;;  %v369_v11 = vunpack.c.h.bf16 %v367_v6  ;;  %412 = vmatprep.subr.mxu0 %v237_v12  ;;  %v236_v13 = vld [vmem:[#allocation2 + $0x30] sm:$0xff]  ;;  %v235_v14 = vld [vmem:[#allocation2 + $0x28] sm:$0xff] }
  0x12   :  { %398 = vmatprep.mubr.msk.f32.mxu1 %vm55_vm0, %v372_v3  ;;  %397 = vmatpush3.msra.mxu1 %v53_v1  ;;  %v234_v15 = vld [vmem:[#allocation2 + $0x20] sm:$0xff]  ;;  %v233_v16 = vld [vmem:[#allocation2 + $0x18] sm:$0xff]  ;;  %v232_v17 = vld [vmem:[#allocation2 + $0x10] sm:$0xff] }
  0x13   :  { %399 = vmatmul.mubr.msk.f32.vlgmr.msra.gmra.mxu1 %vm55_vm0, %v373_v4  ;;  %401 = vmatprep.subr.mxu1 %v52_v5  ;;  %v231_v18 = vld [vmem:[#allocation2 + $0x8] sm:$0xff]  ;;  %v230_v19 = vld [vmem:[#allocation2] sm:$0xff] }
  0x14   :  { %402 = vmatpush3.msra.mxu1 %v52_v5  ;;  %409 = vmatprep.mubr.msk.f32.mxu1 %vm137_vm1, %v368_v7  ;;  %v362_v24 = vld [vmem:[%s583_s4] ss:$0 sm:$0xff]  ;;  %s490_s4 = smov [#allocation5]  }
  0x15   :  { %403 = vmatprep.subr.mxu1 %v51_v8  ;;  %413 = vmatpush3.msra.mxu0 %v237_v12  ;;  %v363_v31 = vld [vmem:[%s585_s6] ss:$0 sm:$0xff]  ;;  %s346_s23 = sshll.u32 %s490_s4, 4  ;;  %s347_s23 = int_to_ptr.vmem [resolvable:$true] %s346_s23 }
  0x16   :  { %404 = vmatpush3.msra.mxu1 %v51_v8  ;;  %414 = vmatprep.subr.mxu0 %v236_v13  ;;  %s463_s6 = scalar_lea.vmem %s347_s23, 256  ;;  %p468_p6 = scmp.lt.s32.totalorder %s347_s23, %s347_s23 }
  0x17   :  { %405 = vmatprep.subr.mxu1 %v50_v9  ;;  %415 = vmatpush3.msra.mxu0 %v236_v13  ;;  %p464_p5 = scmp.ne.s32.totalorder %s347_s23, %s463_s6  ;;  %p469_p7 = scmp.lt.s32.totalorder %s463_s6, %s463_s6 }
  0x18   :  { %406 = vmatpush3.msra.mxu1 %v50_v9  ;;  %416 = vmatprep.subr.mxu0 %v235_v14 }
  0x19   :  { %407 = vmatprep.subr.mxu1 %v49_v10  ;;  %417 = vmatpush3.msra.mxu0 %v235_v14  ;;  %p470_p8 = por %p469_p7, %p468_p6 }
  0x1a   :  { %408 = vmatpush3.msra.mxu1 %v49_v10  ;;  %418 = vmatprep.subr.mxu0 %v234_v15 }
  0x1b   :  { %410 = vmatmul.mubr.msk.f32.vlgmr.msra.gmra.mxu1 %vm137_vm1, %v369_v11  ;;  %419 = vmatpush3.msra.mxu0 %v234_v15  ;;  %p471_p9 = pnand %p470_p8, %p464_p5 }
  0x1c   :  { %420 = vmatprep.subr.mxu0 %v233_v16 }
  0x1d   :  { %421 = vmatpush3.msra.mxu0 %v233_v16 }
  0x1e   :  { %422 = vmatprep.subr.mxu0 %v232_v17 }
  0x1f   :  { %423 = vmatpush3.msra.mxu0 %v232_v17 }
  0x20   :  { %424 = vmatprep.subr.mxu0 %v231_v18 }
  0x21   :  { %425 = vmatpush3.msra.mxu0 %v231_v18 }
  0x22   :  { %426 = vmatprep.subr.mxu0 %v230_v19 }
  0x23   :  { %427 = vmatpush3.msra.mxu0 %v230_v19 }
  0xd3   :  { %v400_v20 = vpop.f32.mrf.mxu1 }
  0xd5   :  { %v128_v21 = vpop.f32.mrf.mxu1 }
  0xdb   :  { %v411_v22 = vpop.f32.mrf.mxu1 }
  0xdc   :  { %v216_v23 = vadd.f32 %v411_v22, %v400_v20 }
  0xdd   :  { %v210_v25 = vpop.f32.mrf.mxu1 }
  0xde   :  { %v211_v26 = vadd.f32 %v210_v25, %v128_v21  ;;  %v227_v27 = vadd.f32 %v362_v24, %v216_v23 }
  0xe0   :  { %v226_v28 = vadd.f32 %v362_v24, %v211_v26  ;;  %v229_v30 = vmax.f32 %v227_v27, 0.0 }
  0xe2   :  { %v228_v29 = vmax.f32 %v226_v28, 0.0 }
  0xe4   :  { %428 = vmatprep.mubr.msk.f32.mxu0 %vm245_vm2, %v228_v29 }
  0xe5   :  { %429 = vmatmul.mubr.msk.f32.vlgmr.msra.gmra.mxu0 %vm245_vm2, %v229_v30 }
 0x1a5   :  { %v430_v32 = vpop.f32.mrf.mxu0 }
 0x1a6   :  { %v324_v33 = vadd.f32 %v430_v32, %v363_v31 }
 0x1a7   :  { %v318_v34 = vpop.f32.mrf.mxu0 }
 0x1a8   :  { %v328_v35 = vsub.f32 0.0, %v324_v33  ;;  %v319_v36 = vadd.f32 %v363_v31, %v318_v34 }
 0x1aa   :  { %v331_v37 = vmul.f32 1.442695, %v328_v35  ;;  %v327_v38 = vsub.f32 0.0, %v319_v36 }
 0x1ac   :  { %435 = vpow2.f32 %v331_v37  ;;  %v329_v39 = vmul.f32 1.442695, %v327_v38 }
 0x1ae   :  { %437 = vpow2.f32 %v329_v39 }
 0x1b9   :  { %v436_v40 = vpop.eup %435 }
 0x1ba   :  { %v334_v41 = vadd.f32 1.0, %v436_v40 }
 0x1bb   :  { %v438_v42 = vpop.eup %437 }
 0x1bc   :  { %439 = vrcp.f32 %v334_v41  ;;  %v333_v43 = vadd.f32 1.0, %v438_v42 }
 0x1be   :  { %441 = vrcp.f32 %v333_v43 }
 0x1c9   :  { %v440_v44 = vpop.eup %439 }
 0x1ca   :  { %340 = vst.msk [vmem:[#allocation5 + $0x8] sm:$0xff] %vm55_vm0, %v440_v44 }
 0x1cb   :  { %v442_v45 = vpop.eup %441 }
 0x1cc   :  { %339 = vst.msk [vmem:[#allocation5] sm:$0xff] %vm55_vm0, %v442_v45 }
 0x1cd   :  { %474 = shalt.err (!%p471_p9)
}
 0x1ce   :  { %352 = dma.vmem_to_hbm [thread:$0]  %s347_s23, 256, %s586_s7, [#allocation4], %s488_s27, %s488_s27, %s489_s28  }
 0x1cf   :  { %485 = dma.done.wait [#allocation4], 256  }
 0x1d0   :  { %486 = vsyncadd [#allocation4], 4294967040 }
 0x1d1   :  { %356 = vsyncpa [#allocation3], 1 }
 0x1d2   :  { %357 = vsyncpa [#allocation4], 1 }

</bundles_post_ra>
